<compile_context>
chip_gen: v7x
topology: tpu7x:2x2x1
jax: 0.10.0
libtpu: 0.0.40
codegen_flags: <defaults>
</compile_context>

<pallas_src>
import jax
import jax.numpy as jnp
from jax.experimental import pallas as pl
from jax.experimental.pallas import tpu as pltpu


# ----------------------------- Pallas kernel ------------------------------ #
def _focus_conv_kernel(x_ref, w_ref, shift_ref, o_ref):
    # x_ref:     (K, TS)   space-to-depth pixels (channel-major), bf16
    # w_ref:     (C2, K)   1x1 conv weight with BN scale folded in, f32
    # shift_ref: (C2, 1)   folded BatchNorm shift = beta - mean * scale, f32
    # o_ref:     (C2, TS)  bf16 output tile (lane-dense: TS is the lane dim)
    x = x_ref[...].astype(jnp.float32)  # promote once; f32 MXU path has slack here
    y = jnp.dot(w_ref[...], x, preferred_element_type=jnp.float32) + shift_ref[...]
    # SiLU: y * sigmoid(y), with sigmoid(y) == 0.5*(1 + tanh(0.5*y))
    # -> a single EUP transcendental per element instead of exp + divide.
    o_ref[...] = (0.5 * y * (1.0 + jnp.tanh(0.5 * y))).astype(o_ref.dtype)


def _pick_spatial_tile(s, k, c2, n_batch, x_bytes, o_bytes):
    """Pick the spatial (lane) tile.

    Blocks here are tiny per lane (K and C2 are small), so the binding limits
    are (a) the ~32K-lane sweet spot for lane-dense unmasked stores, (b) an
    explicit double-buffered-block budget, and (c) keeping enough grid steps
    for pipelining / both v7x TensorCores when the batch is small.
    """
    if s <= 1024:
        return s  # single full-extent tile (last dim == full array dim)
    lane_cap = 32768
    budget = 24 << 20  # double-buffered in+out blocks budget (raised via vmem_limit)
    per_lane = 2 * (k * x_bytes + c2 * o_bytes)  # 2x = double buffering
    ts = min(budget // per_lane, lane_cap)
    # Aim for >= ~8 total grid steps (>= 4 per v7x TensorCore) when the batch is
    # small, but never shrink below 8192 lanes (per-step overhead ~0.35 us).
    steps_wanted = pl.cdiv(8, n_batch)
    if steps_wanted > 1:
        ts = min(ts, max(8192, pl.cdiv(s, steps_wanted)))
    ts = max(128, (ts // 128) * 128)
    return s if ts >= s else ts


def _focus_matmul(xs, w2d, shift, *, ts, out_dtype):
    # xs:    (N, K, S)   bf16 space-to-depth input, channel-major per batch
    # w2d:   (C2, K)     f32 BN-folded weight
    # shift: (C2, 1)     f32 BN shift
    # out:   (N, C2, S)  out_dtype (bf16) -> reshapes for free to NCHW
    n, k, s = xs.shape
    c2 = w2d.shape[0]
    grid = (n, pl.cdiv(s, ts))
    x_bytes = xs.dtype.itemsize
    o_bytes = jnp.dtype(out_dtype).itemsize

    # Double-buffered in/out block bytes + headroom.  >= 32 MiB so the raise is
    # a no-op on v6e/v7x defaults and only lifts v5e's 16 MiB scoped default;
    # capped at 48 MiB to stay under v7x's 64 MiB per-TensorCore VMEM.
    block_bytes = 2 * ts * (k * x_bytes + c2 * o_bytes)
    vmem_limit = int(min(48 << 20, max(32 << 20, 2 * block_bytes + (8 << 20))))

    cost = pl.CostEstimate(
        flops=2 * n * s * k * c2,
        transcendentals=n * s * c2,  # one tanh per output element
        bytes_accessed=(
            n * k * s * x_bytes
            + c2 * k * 4
            + c2 * 4
            + n * c2 * s * o_bytes
        ),
    )
    return pl.pallas_call(
        _focus_conv_kernel,
        out_shape=jax.ShapeDtypeStruct((n, c2, s), out_dtype),
        grid_spec=pltpu.PrefetchScalarGridSpec(
            num_scalar_prefetch=0,
            grid=grid,
            in_specs=[
                pl.BlockSpec((None, k, ts), lambda b, j: (b, 0, j)),
                pl.BlockSpec((c2, k), lambda b, j: (0, 0)),
                pl.BlockSpec((c2, 1), lambda b, j: (0, 0)),
            ],
            out_specs=pl.BlockSpec((None, c2, ts), lambda b, j: (b, 0, j)),
        ),
        compiler_params=pltpu.CompilerParams(
            dimension_semantics=("parallel", "parallel"),
            vmem_limit_bytes=vmem_limit,
        ),
        cost_estimate=cost,
    )(xs, w2d, shift)


# ------------------------------ Focus module ------------------------------ #
class Focus:
    """Equivalent of Focus(c1, c2, k=1, s=1, p=None, g=1, act=True) with k=1.

    Parameters are initialized deterministically in-script.  BatchNorm is used
    in inference form (scale folded into the conv weight + a per-channel shift).
    The module returns bf16 (the kernel's lane-dense bf16 output stream).
    """

    def __init__(self, c1, c2, key, eps=1e-5,
                 x_dtype=jnp.bfloat16, out_dtype=jnp.bfloat16):
        self.c1, self.c2, self.eps = c1, c2, eps
        self.x_dtype = x_dtype
        self.out_dtype = out_dtype
        k_w, k_g, k_b, k_m, k_v = jax.random.split(key, 5)
        # Conv2d(c1*4, c2, kernel_size=1, bias=False) weight: (c2, 4*c1, 1, 1)
        fan_in = 4 * c1
        bound = 1.0 / jnp.sqrt(fan_in)
        self.weight = jax.random.uniform(
            k_w, (c2, 4 * c1, 1, 1), jnp.float32, -bound, bound
        )
        # BatchNorm2d(c2) params / running stats (inference form)
        self.gamma = jax.random.uniform(k_g, (c2,), jnp.float32, 0.5, 1.5)
        self.beta = jax.random.uniform(k_b, (c2,), jnp.float32, -0.5, 0.5)
        self.running_mean = jax.random.uniform(k_m, (c2,), jnp.float32, -0.5, 0.5)
        self.running_var = jax.random.uniform(k_v, (c2,), jnp.float32, 0.5, 1.5)

    def __call__(self, x):
        # x: NCHW (N, c1, H, W), H and W even.
        n, c, h, w = x.shape
        assert c == self.c1 and h % 2 == 0 and w % 2 == 0
        h2, w2 = h // 2, w // 2
        s = h2 * w2
        k_real = 4 * self.c1
        k_pad = (-k_real) % 16  # native bf16 sublane packing (16 rows / vreg)
        k_tot = k_real + k_pad

        # Space-to-depth in torch.cat order; cast to bf16 first so the fused
        # slice/concat pass writes half the bytes.  Result (N, K, H2, W2) is
        # channel-major, so collapsing the spatial dims is a free reshape.
        xh = x.astype(self.x_dtype)
        parts = [
            xh[..., ::2, ::2],
            xh[..., 1::2, ::2],
            xh[..., ::2, 1::2],
            xh[..., 1::2, 1::2],
        ]
        if k_pad:
            parts.append(jnp.zeros((n, k_pad, h2, w2), self.x_dtype))
        xs = jnp.concatenate(parts, axis=1).reshape(n, k_tot, s)

        # Fold BatchNorm (inference) into the weight; keep only the shift.
        # The folded weight stays in f32 (no quantization; it is tiny).
        scale = self.gamma / jnp.sqrt(self.running_var + self.eps)  # (c2,)
        shift = (self.beta - self.running_mean * scale).reshape(self.c2, 1)
        w2d = self.weight.reshape(self.c2, k_real) * scale[:, None]  # (c2, K) f32
        if k_pad:
            w2d = jnp.pad(w2d, ((0, 0), (0, k_pad)))

        ts = _pick_spatial_tile(
            s, k_tot, self.c2, n,
            x_bytes=jnp.dtype(self.x_dtype).itemsize,
            o_bytes=jnp.dtype(self.out_dtype).itemsize,
        )
        y = _focus_matmul(
            xs, w2d.astype(jnp.float32), shift.astype(jnp.float32),
            ts=ts, out_dtype=self.out_dtype,
        )  # (N, C2, S)
        return y.reshape(n, self.c2, h2, w2)  # free reshape: already NCHW order


# ------------------------------ reference --------------------------------- #
def _focus_ref(module, x, cast_inputs=False):
    """Pure-JAX reference.  cast_inputs=True mimics the kernel's bf16 x stream
    (the folded weight stays f32 in both cases, matching the kernel)."""
    xs = jnp.concatenate(
        (x[..., ::2, ::2], x[..., 1::2, ::2], x[..., ::2, 1::2], x[..., 1::2, 1::2]),
        axis=1,
    )
    k = 4 * module.c1
    scale = module.gamma / jnp.sqrt(module.running_var + module.eps)
    shift = module.beta - module.running_mean * scale
    w2d = module.weight.reshape(module.c2, k) * scale[:, None]
    if cast_inputs:
        xs = xs.astype(module.x_dtype).astype(jnp.float32)
    y = jnp.einsum("nchw,oc->nohw", xs, w2d, preferred_element_type=jnp.float32)
    y = y + shift[None, :, None, None]
    return y * jax.nn.sigmoid(y)


# --------------------------------- main ------------------------------------ #
if __name__ == "__main__":
    key = jax.random.PRNGKey(0)
    k_x, k_p = jax.random.split(key)

    N, C1, H, W = 2, 4, 16, 16
    C2 = 32
    x = jax.random.normal(k_x, (N, C1, H, W), jnp.float32)

    focus = Focus(C1, C2, k_p)
    out = jax.block_until_ready(focus(x))
    assert out.shape == (N, C2, H // 2, W // 2), out.shape
    assert out.dtype == jnp.bfloat16, out.dtype
    out_f32 = out.astype(jnp.float32)

    # Check against a reference fed the same bf16-cast activations (validates
    # the matmul / BN-fold / SiLU math); tolerance covers the bf16 output store.
    ref_matched = _focus_ref(focus, x, cast_inputs=True)
    err_m = float(jnp.max(jnp.abs(out_f32 - ref_matched)))
    assert jnp.allclose(out_f32, ref_matched, atol=5e-2, rtol=5e-2), err_m

    # Loose check against the exact f32 reference (bf16 activation/output
    # rounding only introduces ~1e-2-level differences at these magnitudes).
    ref_f32 = _focus_ref(focus, x)
    err_f = float(jnp.max(jnp.abs(out_f32 - ref_f32)))
    assert jnp.allclose(out_f32, ref_f32, atol=1.5e-1, rtol=1.5e-1), err_f

    print("KERNEL_OK")
</pallas_src>

<mosaic_0001>
module attributes {stable_mosaic.version = 11 : i64} {
  func.func @_focus_conv_kernel(%arg0: i32, %arg1: i32, %arg2: memref<1x16x64xbf16, #tpu.memory_space<vmem>>, %arg3: memref<32x16xf32, #tpu.memory_space<vmem>>, %arg4: memref<32x1xf32, #tpu.memory_space<vmem>>, %arg5: memref<1x32x64xbf16, #tpu.memory_space<vmem>>) attributes {dimension_semantics = [#tpu.dimension_semantics<parallel>, #tpu.dimension_semantics<parallel>], iteration_bounds = array<i64: 2, 1>, scalar_prefetch = 0 : i64, scratch_operands = 0 : i64, tpu.core_type = #tpu.core_type<tc>, window_params = [{transform_indices = @transform_0, window_bounds = array<i64: 1, 16, 64>}, {pipeline_mode = #tpu.pipeline_mode<synchronous>, transform_indices = @transform_1, window_bounds = array<i64: 32, 16>}, {pipeline_mode = #tpu.pipeline_mode<synchronous>, transform_indices = @transform_2, window_bounds = array<i64: 32, 1>}, {transform_indices = @transform_3, window_bounds = array<i64: 1, 32, 64>}]} {
    %c0 = arith.constant 0 : index
    %c0_0 = arith.constant 0 : index
    %c0_1 = arith.constant 0 : index
    %0 = vector.load %arg2[%c0, %c0_0, %c0_1] : memref<1x16x64xbf16, #tpu.memory_space<vmem>>, vector<1x16x64xbf16>
    %1 = vector.shape_cast %0 : vector<1x16x64xbf16> to vector<16x64xbf16>
    %2 = arith.extf %1 : vector<16x64xbf16> to vector<16x64xf32>
    %c0_2 = arith.constant 0 : index
    %c0_3 = arith.constant 0 : index
    %3 = vector.load %arg3[%c0_2, %c0_3] : memref<32x16xf32, #tpu.memory_space<vmem>>, vector<32x16xf32>
    %cst = arith.constant dense<0.000000e+00> : vector<32x64xf32>
    %4 = tpu.matmul %3, %2, %cst {dimension_numbers = #tpu.dot_dimension_numbers<[1], [0], [0], [1], [0, 0, 1, 1], [], []>} : vector<32x16xf32>, vector<16x64xf32>, vector<32x64xf32> -> vector<32x64xf32>
    %c0_4 = arith.constant 0 : index
    %c0_5 = arith.constant 0 : index
    %5 = vector.load %arg4[%c0_4, %c0_5] : memref<32x1xf32, #tpu.memory_space<vmem>>, vector<32x1xf32>
    %6 = vector.broadcast %5 : vector<32x1xf32> to vector<32x64xf32>
    %7 = arith.addf %4, %6 : vector<32x64xf32>
    %cst_6 = arith.constant 5.000000e-01 : f32
    %8 = vector.broadcast %cst_6 : f32 to vector<32x64xf32>
    %9 = arith.mulf %8, %7 : vector<32x64xf32>
    %cst_7 = arith.constant 5.000000e-01 : f32
    %10 = vector.broadcast %cst_7 : f32 to vector<32x64xf32>
    %11 = arith.mulf %10, %7 : vector<32x64xf32>
    %12 = math.tanh %11 : vector<32x64xf32>
    %cst_8 = arith.constant 1.000000e+00 : f32
    %13 = vector.broadcast %cst_8 : f32 to vector<32x64xf32>
    %14 = arith.addf %13, %12 : vector<32x64xf32>
    %15 = arith.mulf %9, %14 : vector<32x64xf32>
    %16 = arith.truncf %15 : vector<32x64xf32> to vector<32x64xbf16>
    %c0_9 = arith.constant 0 : index
    %c0_10 = arith.constant 0 : index
    %c0_11 = arith.constant 0 : index
    %17 = vector.load %arg5[%c0_9, %c0_10, %c0_11] : memref<1x32x64xbf16, #tpu.memory_space<vmem>>, vector<1x32x64xbf16>
    %18 = vector.shape_cast %17 : vector<1x32x64xbf16> to vector<32x64xbf16>
    %19 = vector.shape_cast %16 : vector<32x64xbf16> to vector<1x32x64xbf16>
    tpu.vector_store %arg5[%c0_9, %c0_10, %c0_11], %19 {strides = array<i32>} : memref<1x32x64xbf16, #tpu.memory_space<vmem>>, vector<1x32x64xbf16>,
    return
  }
  func.func @transform_0(%arg0: i32, %arg1: i32) -> (i32, i32, i32) {
    %c0_i32 = arith.constant 0 : i32
    %c0_i32_0 = arith.constant 0 : i32
    return %arg0, %c0_i32, %arg1 : i32, i32, i32
  }
  func.func @transform_1(%arg0: i32, %arg1: i32) -> (i32, i32) {
    %c0_i32 = arith.constant 0 : i32
    %c0_i32_0 = arith.constant 0 : i32
    %c0_i32_1 = arith.constant 0 : i32
    return %c0_i32, %c0_i32_0 : i32, i32
  }
  func.func @transform_2(%arg0: i32, %arg1: i32) -> (i32, i32) {
    %c0_i32 = arith.constant 0 : i32
    %c0_i32_0 = arith.constant 0 : i32
    %c0_i32_1 = arith.constant 0 : i32
    return %c0_i32, %c0_i32_0 : i32, i32
  }
  func.func @transform_3(%arg0: i32, %arg1: i32) -> (i32, i32, i32) {
    %c0_i32 = arith.constant 0 : i32
    %c0_i32_0 = arith.constant 0 : i32
    return %arg0, %c0_i32, %arg1 : i32, i32, i32
  }
}

</mosaic_0001>

<bundles_post_ra>
// kernel: tpu_custom_call.1
= control target key start
LH: loop header
LB: loop body
LE: loop exit
PB: predicated region body
PF: predicated region fallthrough
CT: control target
= control target key end

     0   :  { %8 = vsyncpa [#allocation3], 0  ;;  %s826_s0 = inlined_call_operand.vmem [shape: bf16[2,16,64], index: 0, kind: input, shape index: {}]   ;;  %s827_s1 = inlined_call_operand.vmem [shape: f32[32,16], index: 1, kind: input, shape index: {}]   ;;  %s828_s2 = inlined_call_operand.vmem [shape: f32[32,1], index: 2, kind: input, shape index: {}]   ;;  %s829_s3 = inlined_call_operand.hbm [shape: bf16[2,32,64], index: 3, kind: output, shape index: {}]  }
   0x1   :  { %10 = vsyncpa [#allocation3 + $0x1], 0  ;;  %s679_s12 = smov 0   ;;  %s681_s13 = smov 0  }
   0x2   :  { %s683_s14 = smov 0   ;;  %s685_s15 = smov 0  }
   0x3   :  { %s687_s16 = smov 0   ;;  %s689_s17 = smov 0  }
   0x4 LB: > { %s454_s18 = sadd.s32 4294967295, %s653_s17   ;;  %s455_s19 = sadd.s32 4294967294, %s653_s17   ;;  %s653_s17 = sphi %s689_s17, %s16_s17   ;;  %s649_s16 = sphi %s687_s16, %s836_s16   ;;  %s645_s15 = sphi %s685_s15, %s835_s15   ;;  %s641_s14 = sphi %s683_s14, %s834_s14   ;;  %s637_s13 = sphi %s681_s13, %s833_s13   ;;  %s633_s12 = sphi %s679_s12, %s832_s12  }
   0x5   : > { %s28_s20 = sadd.s32 1, %s649_s16  ;;  %s107_s21 = sadd.s32 1, %s641_s14 }
   0x6   : > { %p30_p0 = scmp.ge.s32.totalorder %s28_s20, 2  ;;  %p117_p1 = scmp.ne.s32.totalorder %s641_s14, %s637_s13 }
   0x7   : > { %p118_p2 = scmp.eq.s32.totalorder %s454_s18, 1  ;;  %p123_p3 = scmp.ne.s32.totalorder %s637_s13, %s633_s12 }
   0x8   : > { %s838_s20 = smov (%p30_p0, %s28_s20), 0  ;;  %p124_p5 = scmp.eq.s32.totalorder %s455_s19, 1 }
   0x9   : > { %p719_p4 = por %p118_p2, %p117_p1  ;;  %s102_s23 = ssub.s32 %s649_s16, %s838_s20 }
   0xa   : > { %p458_p6 = scmp.ge.s32.totalorder %s653_s17, 1  ;;  %p105_p7 = scmp.eq.s32.totalorder %s102_s23, 0 }
   0xb   : > { %p726_p8 = por %p124_p5, %p123_p3  ;;  %p159_p9 = scmp.lt.s32.totalorder %s653_s17, 3 }
   0xc   : > { %s732_s25 = scalar_select %p105_p7, %s641_s14, %s107_s21  }
   0xd   : > { %p160_p10 = pnand %p458_p6, %p159_p9 }
   0xe   : > { %p186_p11 = scmp.lt.s32.totalorder (!%p160_p10), %s645_s15, 1  ;;  %v198_v0 = vld [vmem:[%s827_s1] sm:$0xff] (!%p160_p10)  ;;  %vm226_vm0 = vcmask (!%p160_p10), 130048   ;;  %v200_v1 = vld [vmem:[%s827_s1 + $0x10] sm:$0xff] (!%p160_p10)  ;;  %v655_v4 = vmov (!%p160_p10), 0   ;;  %v205_v6 = vld [vmem:[%s828_s2 + $0x18] sm:$0xff] (!%p160_p10) }
   0xf   : > { %163 = sbr.rel (%p160_p10) target bundleno = 282 (0x11a), region = 32  ;;  %495 = vmatprep.mubr.msk.f32.mxu0 (!%p160_p10), %vm226_vm0, %v198_v0  ;;  %498 = vmatprep.mubr.msk.f32.mxu1 (!%p160_p10), %vm226_vm0, %v200_v1  ;;  %v204_v2 = vld [vmem:[%s828_s2 + $0x10] sm:$0xff] (!%p160_p10)  ;;  %v202_v3 = vld [vmem:[%s828_s2] sm:$0xff] (!%p160_p10)  ;;  %v203_v7 = vld [vmem:[%s828_s2 + $0x8] sm:$0xff] (!%p160_p10)  ;;  %s183_s30 = sand.u32 (!%p160_p10), 1, %s637_s13   ;;  %vm356_vm1 = vcmask (!%p160_p10), 519168  }
  0x10   : > { %566 = vset.pattern.permute.xlu1 (!%p160_p10), %v655_v4  ;;  %565 = vset.pattern.permute.xlu0 (!%p160_p10), %v655_v4  ;;  %v199_v8 = vld [vmem:[%s827_s1 + $0x8] sm:$0xff] (!%p160_p10)  ;;  %v201_v9 = vld [vmem:[%s827_s1 + $0x18] sm:$0xff] (!%p160_p10)  ;;  %s459_s4 = sshll.u32 (!%p160_p10), %s183_s30, 4  ;;  %s480_s5 = sshll.u32 (!%p160_p10), %s645_s15, 8 }
  0x11   : > { %218 = vperm.xlu1 (!%p160_p10), %566, %v204_v2   ;;  %208 = vperm.xlu0 (!%p160_p10), %565, %v202_v3   ;;  %s185_s6 = scalar_lea.vmem (!%p160_p10), [#allocation2], %s459_s4  ;;  %s773_s10 = scalar_lea.hbm (!%p160_p10), %s829_s3, %s480_s5 }
  0x12   : > { %s656_s18 = smov (!%p160_p10), [#allocation2]  }
  0x13   : > { %s579_s19 = sshll.u32 (!%p160_p10), %s656_s18, 4  ;;  %s580_s19 = int_to_ptr.vmem [resolvable:$false] %s579_s19 }
  0x14   : > { %s581_s21 = scalar_lea.vmem (!%p160_p10), %s580_s19, 512 }
  0x15   : > { %223 = vperm.xlu1 (!%p160_p10), %566, %v205_v6   ;;  %213 = vperm.xlu0 (!%p160_p10), %565, %v203_v7  }
  0x16   : > { %s187_s7 = scalar_select %p186_p11, %s645_s15, 1 }
  0x17   : > { %s780_s15 = scalar_lea.sflag [#allocation3], %s183_s30 }
  0x18   : > { %s475_s8 = sshll.u32 %s187_s7, 3  ;;  %s376_s7 = sshll.u32 %s185_s6, 4  ;;  %s775_s7 = int_to_ptr.vmem [resolvable:$true] %s376_s7 }
  0x19   : > { %s193_s11 = scalar_lea.vmem %s826_s0, %s475_s8  ;;  %p582_p1 = scmp.lt.s32.totalorder %s775_s7, %s580_s19 }
  0x1a   : > { %v482_v5 = vld [vmem:[%s193_s11] sm:$0xff]   ;;  %s575_s11 = scalar_lea.vmem %s775_s7, 256 }
  0x1b   : > { %502 = vmatprep.subr.bf16.mxu0 %v482_v5  ;;  %505 = vmatprep.subr.bf16.mxu1 %v482_v5  ;;  %p576_p12 = scmp.ne.s32.totalorder %s775_s7, %s575_s11  ;;  %p583_p2 = scmp.lt.s32.totalorder %s581_s21, %s575_s11 }
  0x1c   : > { %504 = vmatpush3.bf16.msra.mxu0 %v482_v5  ;;  %506 = vmatpush3.bf16.msra.mxu1 %v482_v5 }
  0x1d   : > { %p577_p13 = pnand %p576_p12, %p719_p4  ;;  %p584_p3 = por %p583_p2, %p582_p1 }
  0x1f   : > { %496 = vmatmul.mubr.msk.f32.vlgmr.msra.gmra.mrb[0].mxu0 %vm226_vm0, %v199_v8  ;;  %499 = vmatmul.mubr.msk.f32.vlgmr.msra.gmra.mrb[0].mxu1 %vm226_vm0, %v201_v9  ;;  %p578_p0 = pneg %p577_p13 }
  0x21   : > { %p585_p5 = pnand %p584_p3, %p578_p0 }
  0x90   : > { %v219_v10 = vpop.permute.xlu1 %218  ;;  %v209_v11 = vpop.permute.xlu0 %208 }
  0x94   : > { %v224_v12 = vpop.permute.xlu1 %223  ;;  %v214_v13 = vpop.permute.xlu0 %213 }
  0xf2   : > { %v497_v14 = vpop.f32.mrb[0].mxu0  ;;  %v500_v15 = vpop.f32.mrb[0].mxu1 }
  0xf3   : > { %v311_v16 = vadd.f32 %v497_v14, %v214_v13  ;;  %v321_v17 = vadd.f32 %v500_v15, %v224_v12  ;;  %v305_v18 = vpop.f32.mrb[1].mxu0  ;;  %v315_v19 = vpop.f32.mrb[1].mxu1 }
  0xf4   : > { %v306_v20 = vadd.f32 %v305_v18, %v209_v11  ;;  %v316_v21 = vadd.f32 %v315_v19, %v219_v10 }
  0xf5   : > { %v325_v22 = vmul.f32 0.5, %v311_v16  ;;  %v327_v23 = vmul.f32 0.5, %v321_v17 }
  0xf6   : > { %v324_v24 = vmul.f32 0.5, %v306_v20  ;;  %v326_v25 = vmul.f32 0.5, %v316_v21 }
  0xf7   : > { %567 = vtanh.f32 %v325_v22 }
  0xf8   : > { %569 = vtanh.f32 %v327_v23 }
  0xf9   : > { %571 = vtanh.f32 %v324_v24 }
  0xfa   : > { %573 = vtanh.f32 %v326_v25 }
 0x101   : > { %v568_v26 = vpop.eup %567 }
 0x102   : > { %v570_v27 = vpop.eup %569  ;;  %v333_v28 = vadd.f32 1.0, %v568_v26 }
 0x103   : > { %v572_v29 = vpop.eup %571  ;;  %v335_v30 = vadd.f32 1.0, %v570_v27 }
 0x104   : > { %v574_v31 = vpop.eup %573  ;;  %v337_v32 = vmul.f32 %v333_v28, %v325_v22  ;;  %v332_v33 = vadd.f32 1.0, %v572_v29 }
 0x105   : > { %v339_v34 = vmul.f32 %v335_v30, %v327_v23  ;;  %v334_v35 = vadd.f32 1.0, %v574_v31 }
 0x106   : > { %v477_v36 = vpack.c.bf16 %v337_v32, %v337_v32  ;;  %v336_v37 = vmul.f32 %v332_v33, %v324_v24 }
 0x107   : > { %v479_v38 = vpack.c.bf16 %v339_v34, %v339_v34  ;;  %v338_v39 = vmul.f32 %v334_v35, %v326_v25 }
 0x108   : > { %358 = vst.msk [vmem:[%s185_s6 + $0x4] sm:$0xf] %vm356_vm1, %v477_v36  ;;  %v476_v40 = vpack.c.bf16 %v336_v37, %v336_v37 }
 0x109   : > { %360 = vst.msk [vmem:[%s185_s6 + $0xc] sm:$0xf] %vm356_vm1, %v479_v38  ;;  %v478_v41 = vpack.c.bf16 %v338_v39, %v338_v39 }
 0x10a   : > { %357 = vst.msk [vmem:[%s185_s6] sm:$0xf] %vm356_vm1, %v476_v40 }
 0x10b   : > { %359 = vst.msk [vmem:[%s185_s6 + $0x8] sm:$0xf] %vm356_vm1, %v478_v41 }
 0x10c   : > { %588 = shalt.err (!%p585_p5)
}
 0x10d   : > { %s589_s23 = scalar_lea.hbm %s773_s10, 256  ;;  %s593_s28 = scalar_lea.hbm %s829_s3, 512 }
 0x10e   : > { %p590_p6 = scmp.ne.s32.totalorder %s773_s10, %s589_s23  ;;  %p594_p10 = scmp.lt.u32.totalorder %s773_s10, %s829_s3 }
 0x10f   : > { %p595_p11 = scmp.lt.u32.totalorder %s593_s28, %s589_s23  ;;  %p597_p13 = scmp.lt.u32.totalorder %s589_s23, %s773_s10 }
 0x110   : > { %p591_p7 = pnand %p590_p6, %p719_p4 }
 0x111   : > { %p596_p12 = por %p595_p11, %p594_p10 }
 0x112   : > { %p592_p9 = pneg %p591_p7 }
 0x113   : > { %p598_p0 = por %p597_p13, %p596_p12 }
 0x115   : > { %p599_p1 = pnand %p598_p0, %p592_p9 }
 0x117   : > { %602 = shalt.err (!%p599_p1)
}
 0x118   : > { %s657_s4 = smov 64   ;;  %s658_s5 = smov 4  }
 0x119   : > { %507 = dma.vmem_to_hbm [thread:$0]  (%p719_p4), %s775_s7, 256, %s773_s10, %s780_s15, %s657_s4, %s657_s4, %s658_s5  }
 0x11a PF: > { %p513_p2 = scmp.ge.s32.totalorder %s653_s17, 2  ;;  %s391_s6 = sand.u32 1, %s633_s12  }
 0x11b   : > { %s392_s8 = scalar_lea.sflag [#allocation3], %s391_s6 }
 0x11c   : > { %p510_p3 = pnand %p513_p2, %p726_p8 }
 0x11e   : > { %628 = dma.done.wait (!%p510_p3), %s392_s8, 256  }
 0x11f   : > { %630 = vsyncadd (!%p510_p3), %s392_s8, 4294967040  ;;  %s16_s17 = sadd.s32 1, %s653_s17   ;;  %s832_s12 = smov %s637_s13 }
 0x120   : > { %p13_p5 = scmp.ge.s32.totalorder %s16_s17, 4   ;;  %s833_s13 = smov %s641_s14 }
 0x121   : > { %s834_s14 = smov %s732_s25  ;;  %s835_s15 = smov %s649_s16 }
 0x122   : > { %s836_s16 = smov %s838_s20  ;;  %15 = sbr.rel (!%p13_p5) target bundleno = 4 (0x4), region = 67 }
 0x129   :  { %397 = vsyncpa [#allocation3], 1 }
 0x12a   :  { %399 = vsyncpa [#allocation3 + $0x1], 1 }

</bundles_post_ra>
